<compile_context>
chip_gen: v7x
topology: tpu7x:2x2x1
jax: 0.10.0
libtpu: 0.0.40
codegen_flags: <defaults>
</compile_context>

<pallas_src>
import jax
import jax.numpy as jnp
from jax.experimental import pallas as pl
from jax.experimental.pallas import tpu as pltpu


def _linear_kernel(x_ref, w_ref, b_ref, o_ref):
    # x_ref : (trows, Keff)   streamed tile of (packed) entity embeddings
    # w_ref : (Keff, Neff)    resident (packed, pre-transposed) weight
    # b_ref : (1, Neff)       resident bias (f32)
    # o_ref : (trows, Neff)   lane-dense output tile
    acc = jnp.dot(x_ref[...], w_ref[...], preferred_element_type=jnp.float32)
    o_ref[...] = (acc + b_ref[...]).astype(o_ref.dtype)


def _vmem_capacity_bytes():
    """Per-TensorCore VMEM capacity; conservative v7x fallback if unavailable."""
    try:
        info = pltpu.get_tpu_info()
        cap = getattr(info, "vmem_capacity_bytes", None)
        if cap:
            return int(cap)
    except Exception:
        pass
    return 64 << 20  # v7x has 64 MiB/TC; v5e/v6e have 128 MiB (safe either way)


def e2t_linear(x, w, b, *, tm=None, lane_pack=True, out_dtype=jnp.float32):
    """y = x @ w.T + b via a Pallas TPU kernel.

    x: [M, K], w: [N, K], b: [N]  ->  y: [M, N] in `out_dtype`.

    X is streamed in the dtype it arrives in (no wrapper-side cast/pad copy).
    Default (f32 x, f32 out) matches the PyTorch f32 reference; pass a bf16
    entity table and/or out_dtype=bf16 as an explicit opt-in for ~2x / ~1.3x
    less HBM traffic.  `tm` (entity rows per tile) is auto-sized from VMEM.
    """
    M, K = x.shape
    N, K2 = w.shape
    assert K == K2 and b.shape == (N,)

    x_bytes = jnp.dtype(x.dtype).itemsize
    out_bytes = jnp.dtype(out_dtype).itemsize
    sub = 16 if x_bytes == 2 else 8          # native sublane rows for streamed dtype

    # Lane-dense packing factor: fold P consecutive entity rows into one packed
    # row so output stores are full 128-lane vst instead of masked vst.msk.
    # Requires M % P == 0 so the repack reshape is a free row-major view.
    P = 128 // N if (lane_pack and N < 128 and 128 % N == 0
                     and M % (128 // N) == 0) else 1

    # ---- operand prep (no copies of X) --------------------------------------
    wt = w.T.astype(x.dtype)                 # (K, N) pre-transposed; tiny
    bf = b.astype(jnp.float32)
    if P > 1:
        Keff, Neff = P * K, P * N
        xp = x.reshape(M // P, Keff)                         # free repack
        wp = jnp.kron(jnp.eye(P, dtype=wt.dtype), wt)        # (Keff, Neff) block-diag
        bp = jnp.tile(bf, P).reshape(1, Neff)
        rows = M // P
    else:
        Keff, Neff = K, N
        xp, wp = x, wt
        bp = bf.reshape(1, N)
        rows = M

    # ---- tile selection ------------------------------------------------------
    vmem_cap = _vmem_capacity_bytes()
    budget = vmem_cap // 2                                   # tile-memory target
    per_row = 2 * Keff * x_bytes + 2 * Neff * out_bytes      # dbl-buffered X + Y
    fixed = 2 * (Keff * Neff * x_bytes + Neff * 4)           # resident W + bias
    avail = max(budget - fixed, per_row * sub)
    trows_max = max(sub, (avail // per_row) // sub * sub)
    if tm is not None:                                       # optional user cap (entity rows)
        trows_max = max(sub, min(trows_max, max(sub, (int(tm) // P) // sub * sub)))

    if trows_max >= rows:
        trows = rows                                         # single full-extent block
    else:
        trows = trows_max
        steps = pl.cdiv(rows, trows)
        if steps > 1 and steps % 2:                          # even split -> both v7x TCs busy
            trows = max(sub, pl.cdiv(pl.cdiv(rows, steps + 1), sub) * sub)
    grid = (pl.cdiv(rows, trows),)                           # ragged last block masked by Pallas

    flops = 2 * rows * Keff * Neff
    bytes_accessed = ((rows * Keff + Keff * Neff) * x_bytes
                      + Neff * 4 + rows * Neff * out_bytes)
    vmem_need = 2 * (trows * Keff * x_bytes + trows * Neff * out_bytes
                     + Keff * Neff * x_bytes + Neff * 4)
    vmem_limit = int(min(max(vmem_need + (8 << 20), 32 << 20), vmem_cap * 3 // 4))

    y = pl.pallas_call(
        _linear_kernel,
        out_shape=jax.ShapeDtypeStruct((rows, Neff), out_dtype),
        grid_spec=pltpu.PrefetchScalarGridSpec(
            num_scalar_prefetch=0,
            grid=grid,
            in_specs=[
                pl.BlockSpec((trows, Keff), lambda i: (i, 0)),   # streamed X tile
                pl.BlockSpec(wp.shape, lambda i: (0, 0)),        # resident weight
                pl.BlockSpec((1, Neff), lambda i: (0, 0)),       # resident bias
            ],
            out_specs=pl.BlockSpec((trows, Neff), lambda i: (i, 0)),
        ),
        compiler_params=pltpu.CompilerParams(
            dimension_semantics=("parallel",),
            vmem_limit_bytes=vmem_limit,
        ),
        cost_estimate=pl.CostEstimate(
            flops=flops, transcendentals=0, bytes_accessed=bytes_accessed),
    )(xp, wp, bp)

    if P > 1:
        y = y.reshape(M, N)                                  # free unpack
    return y


class ConnectE2T_TRT:
    """JAX port of the PyTorch ConnectE2T_TRT module (forward only)."""

    def __init__(self, initial_entity_emb, initial_relation_emb,
                 initial_type_emb, initial_short_relation_emb, key):
        e_size = initial_entity_emb.shape[1]
        et_size = initial_type_emb.shape[1]

        self.final_entity_embeddings = initial_entity_emb
        self.final_relation_embeddings = initial_relation_emb
        self.final_short_relation_embeddings = initial_short_relation_emb
        self.final_type_embeddings = initial_type_emb

        # nn.Linear(e_size, et_size): weight [et_size, e_size], bias [et_size].
        # Deterministic init mimicking PyTorch's uniform(-1/sqrt(fan_in), ...).
        kw, kb = jax.random.split(key)
        bound = 1.0 / jnp.sqrt(float(e_size))
        self.e2t_weight = jax.random.uniform(
            kw, (et_size, e_size), jnp.float32, -bound, bound)
        self.e2t_bias = jax.random.uniform(
            kb, (et_size,), jnp.float32, -bound, bound)

    def forward(self):
        e2t = e2t_linear(self.final_entity_embeddings,
                         self.e2t_weight, self.e2t_bias)
        return (e2t,
                self.final_relation_embeddings,
                self.final_short_relation_embeddings,
                self.final_type_embeddings)


if __name__ == "__main__":
    key = jax.random.PRNGKey(0)
    k_e, k_r, k_t, k_sr, k_lin = jax.random.split(key, 5)

    # Small, shape-consistent synthetic "knowledge graph" embeddings.
    num_entities, e_size = 200, 64
    num_relations, r_size = 16, 32
    num_types, et_size = 48, 32

    entity_emb = jax.random.normal(k_e, (num_entities, e_size), jnp.float32)
    relation_emb = jax.random.normal(k_r, (num_relations, r_size), jnp.float32)
    type_emb = jax.random.normal(k_t, (num_types, et_size), jnp.float32)
    short_relation_emb = jax.random.normal(
        k_sr, (num_relations, et_size), jnp.float32)

    model = ConnectE2T_TRT(entity_emb, relation_emb, type_emb,
                           short_relation_emb, k_lin)

    out_e2t, out_rel, out_srel, out_type = model.forward()
    jax.block_until_ready((out_e2t, out_rel, out_srel, out_type))

    # References.
    w, b = model.e2t_weight, model.e2t_bias
    ref_f32 = entity_emb @ w.T + b
    xq = entity_emb.astype(jnp.bfloat16).astype(jnp.float32)
    wq = w.astype(jnp.bfloat16).astype(jnp.float32)
    ref_bf16 = xq @ wq.T + b

    # Default path: f32 streaming, lane-dense packed, single full-extent tile.
    assert out_e2t.shape == (num_entities, et_size)
    assert jnp.allclose(out_e2t, ref_f32, atol=1e-4, rtol=1e-4)

    # Multi-tile grid with a ragged last block (no wrapper-side padding).
    out_mt = e2t_linear(entity_emb, w, b, tm=64)
    jax.block_until_ready(out_mt)
    assert jnp.allclose(out_mt, ref_f32, atol=1e-4, rtol=1e-4)

    # Explicit opt-in: bf16 entity table streamed directly (halved X read traffic).
    out_bx = e2t_linear(entity_emb.astype(jnp.bfloat16), w, b)
    jax.block_until_ready(out_bx)
    assert jnp.allclose(out_bx, ref_bf16, atol=5e-3, rtol=5e-3)

    # Explicit opt-in: bf16 output (f32 accumulate, cast at the store).
    out_bo = e2t_linear(entity_emb, w, b, out_dtype=jnp.bfloat16)
    jax.block_until_ready(out_bo)
    assert jnp.allclose(out_bo.astype(jnp.float32), ref_f32, atol=3e-2, rtol=3e-2)

    # Unpacked fallback path (debug-only; masked narrow-lane stores).
    out_np = e2t_linear(entity_emb, w, b, lane_pack=False)
    jax.block_until_ready(out_np)
    assert jnp.allclose(out_np, ref_f32, atol=1e-4, rtol=1e-4)

    assert out_rel.shape == (num_relations, r_size)
    assert out_srel.shape == (num_relations, et_size)
    assert out_type.shape == (num_types, et_size)

    print("KERNEL_OK")
</pallas_src>

<mosaic_0001>
module attributes {stable_mosaic.version = 11 : i64} {
  func.func @_linear_kernel(%arg0: i32, %arg1: memref<50x256xf32, #tpu.memory_space<vmem>>, %arg2: memref<256x128xf32, #tpu.memory_space<vmem>>, %arg3: memref<1x128xf32, #tpu.memory_space<vmem>>, %arg4: memref<50x128xf32, #tpu.memory_space<vmem>>) attributes {dimension_semantics = [#tpu.dimension_semantics<parallel>], iteration_bounds = array<i64: 1>, scalar_prefetch = 0 : i64, scratch_operands = 0 : i64, tpu.core_type = #tpu.core_type<tc>, window_params = [{transform_indices = @transform_0, window_bounds = array<i64: 50, 256>}, {pipeline_mode = #tpu.pipeline_mode<synchronous>, transform_indices = @transform_1, window_bounds = array<i64: 256, 128>}, {pipeline_mode = #tpu.pipeline_mode<synchronous>, transform_indices = @transform_2, window_bounds = array<i64: 1, 128>}, {transform_indices = @transform_3, window_bounds = array<i64: 50, 128>}]} {
    %c0 = arith.constant 0 : index
    %c0_0 = arith.constant 0 : index
    %0 = vector.load %arg1[%c0, %c0_0] : memref<50x256xf32, #tpu.memory_space<vmem>>, vector<50x256xf32>
    %c0_1 = arith.constant 0 : index
    %c0_2 = arith.constant 0 : index
    %1 = vector.load %arg2[%c0_1, %c0_2] : memref<256x128xf32, #tpu.memory_space<vmem>>, vector<256x128xf32>
    %cst = arith.constant dense<0.000000e+00> : vector<50x128xf32>
    %2 = tpu.matmul %0, %1, %cst {dimension_numbers = #tpu.dot_dimension_numbers<[1], [0], [0], [1], [0, 0, 1, 1], [], []>} : vector<50x256xf32>, vector<256x128xf32>, vector<50x128xf32> -> vector<50x128xf32>
    %c0_3 = arith.constant 0 : index
    %c0_4 = arith.constant 0 : index
    %3 = vector.load %arg3[%c0_3, %c0_4] : memref<1x128xf32, #tpu.memory_space<vmem>>, vector<1x128xf32>
    %4 = vector.broadcast %3 : vector<1x128xf32> to vector<50x128xf32>
    %5 = arith.addf %2, %4 : vector<50x128xf32>
    %c0_5 = arith.constant 0 : index
    %c0_6 = arith.constant 0 : index
    %6 = vector.load %arg4[%c0_5, %c0_6] : memref<50x128xf32, #tpu.memory_space<vmem>>, vector<50x128xf32>
    tpu.vector_store %arg4[%c0_5, %c0_6], %5 {strides = array<i32>} : memref<50x128xf32, #tpu.memory_space<vmem>>, vector<50x128xf32>,
    return
  }
  func.func @transform_0(%arg0: i32) -> (i32, i32) {
    %c0_i32 = arith.constant 0 : i32
    %c0_i32_0 = arith.constant 0 : i32
    return %arg0, %c0_i32 : i32, i32
  }
  func.func @transform_1(%arg0: i32) -> (i32, i32) {
    %c0_i32 = arith.constant 0 : i32
    %c0_i32_0 = arith.constant 0 : i32
    %c0_i32_1 = arith.constant 0 : i32
    return %c0_i32, %c0_i32_0 : i32, i32
  }
  func.func @transform_2(%arg0: i32) -> (i32, i32) {
    %c0_i32 = arith.constant 0 : i32
    %c0_i32_0 = arith.constant 0 : i32
    %c0_i32_1 = arith.constant 0 : i32
    return %c0_i32, %c0_i32_0 : i32, i32
  }
  func.func @transform_3(%arg0: i32) -> (i32, i32) {
    %c0_i32 = arith.constant 0 : i32
    %c0_i32_0 = arith.constant 0 : i32
    return %arg0, %c0_i32 : i32, i32
  }
}

</mosaic_0001>

<bundles_post_ra>
// kernel: tpu_custom_call.1
= control target key start
LH: loop header
LB: loop body
LE: loop exit
PB: predicated region body
PF: predicated region fallthrough
CT: control target
= control target key end

     0   :  { %8 = vsyncpa [#allocation3], 0  ;;  %s474_s0 = inlined_call_operand.hbm [shape: f32[50,256], index: 0, kind: input, shape index: {}]   ;;  %s475_s1 = inlined_call_operand.hbm [shape: f32[256,128], index: 1, kind: input, shape index: {}]   ;;  %s476_s2 = inlined_call_operand.vmem [shape: f32[1,128], index: 2, kind: input, shape index: {}]   ;;  %s477_s3 = inlined_call_operand.hbm [shape: f32[50,128], index: 3, kind: output, shape index: {}]  }
   0x1   :  { %9 = vsyncpa [#allocation6], 0 }
   0x2   :  { %10 = vsyncpa [#allocation4], 0  ;;  %s402_s12 = smov [#allocation2]   ;;  %s330_s16 = scalar_lea.hbm %s474_s0, 1792 }
   0x3   :  { %s16_s13 = sshll.u32 %s402_s12, 4  ;;  %p331_p0 = scmp.ne.s32.totalorder %s474_s0, %s330_s16  ;;  %s17_s13 = int_to_ptr.vmem [resolvable:$true] %s16_s13 }
   0x4   :  { %p334_p1 = scmp.lt.u32.totalorder %s330_s16, %s474_s0 }
   0x6   :  { %p336_p2 = pnand %p334_p1, %p331_p0 }
   0x8   :  { %339 = shalt.err (!%p336_p2)
}
   0x9   :  { %s340_s21 = scalar_lea.vmem %s17_s13, 1792  ;;  %p345_p4 = scmp.lt.s32.totalorder %s17_s13, %s17_s13 }
   0xa   :  { %p341_p3 = scmp.ne.s32.totalorder %s17_s13, %s340_s21  ;;  %p346_p5 = scmp.lt.s32.totalorder %s340_s21, %s340_s21 }
   0xc   :  { %p347_p6 = por %p346_p5, %p345_p4 }
   0xe   :  { %p348_p7 = pnand %p347_p6, %p341_p3 }
  0x10   :  { %351 = shalt.err (!%p348_p7)
}
  0x11   :  { %s403_s22 = smov 256   ;;  %s404_s23 = smov 16  }
  0x12   :  { %22 = dma.hbm_to_vmem [thread:$0]  %s474_s0, 1792, %s17_s13, [#allocation3], %s403_s22, %s403_s22, %s404_s23  }
  0x13   :  { %s405_s26 = smov [#allocation5]   ;;  %s352_s30 = scalar_lea.hbm %s475_s1, 4096 }
  0x14   :  { %s28_s27 = sshll.u32 %s405_s26, 4  ;;  %p353_p8 = scmp.ne.s32.totalorder %s475_s1, %s352_s30  ;;  %s29_s27 = int_to_ptr.vmem [resolvable:$true] %s28_s27 }
  0x15   :  { %p356_p9 = scmp.lt.u32.totalorder %s352_s30, %s475_s1 }
  0x17   :  { %p358_p10 = pnand %p356_p9, %p353_p8 }
  0x19   :  { %361 = shalt.err (!%p358_p10)
}
  0x1a   :  { %s362_s8 = scalar_lea.vmem %s29_s27, 4096  ;;  %p367_p12 = scmp.lt.s32.totalorder %s29_s27, %s29_s27 }
  0x1b   :  { %p363_p11 = scmp.ne.s32.totalorder %s29_s27, %s362_s8  ;;  %p368_p13 = scmp.lt.s32.totalorder %s362_s8, %s362_s8 }
  0x1d   :  { %p369_p0 = por %p368_p13, %p367_p12 }
  0x1f   :  { %p370_p1 = pnand %p369_p0, %p363_p11 }
  0x21   :  { %373 = shalt.err (!%p370_p1)
}
  0x22   :  { %s406_s0 = smov 128   ;;  %s407_s9 = smov 8  }
  0x23   :  { %34 = dma.hbm_to_vmem [thread:$0]  %s475_s1, 4096, %s29_s27, [#allocation6], %s406_s0, %s406_s0, %s407_s9  }
  0x24   :  { %396 = dma.done.wait [#allocation3], 1792  }
  0x25   :  { %397 = vsyncadd [#allocation3], 4294965504 }
  0x26   :  { %398 = dma.done.wait [#allocation6], 4096  }
  0x27   :  { %399 = vsyncadd [#allocation6], 4294963200  ;;  %v73_v0 = vld [vmem:[#allocation5 + $0x80] sm:$0xff]  ;;  %v74_v1 = vld [vmem:[#allocation5 + $0x88] sm:$0xff] }
  0x28   :  { %v57_v2 = vld [vmem:[#allocation5] sm:$0xff]  ;;  %v275_v3 = vpack.c.bf16 %v74_v1, %v73_v0  ;;  %v58_v4 = vld [vmem:[#allocation5 + $0x8] sm:$0xff]  ;;  %v75_v5 = vld [vmem:[#allocation5 + $0x90] sm:$0xff] }
  0x29   :  { %v76_v6 = vld [vmem:[#allocation5 + $0x98] sm:$0xff]  ;;  %v277_v7 = vpack.c.bf16 %v58_v4, %v57_v2  ;;  %v59_v9 = vld [vmem:[#allocation5 + $0x10] sm:$0xff]  ;;  %v77_v11 = vld [vmem:[#allocation5 + $0xa0] sm:$0xff] }
  0x2a   :  { %v279_v8 = vpack.c.bf16 %v76_v6, %v75_v5  ;;  %v60_v10 = vld [vmem:[#allocation5 + $0x18] sm:$0xff]  ;;  %276 = vmatprep.subr.bf16.mxu0 %v275_v3  ;;  %307 = vmatprep.subr.bf16.mxu1 %v275_v3  ;;  %v78_v12 = vld [vmem:[#allocation5 + $0xa8] sm:$0xff]  ;;  %v61_v15 = vld [vmem:[#allocation5 + $0x20] sm:$0xff] }
  0x2b   :  { %278 = vmatpush3.bf16.msra.mxu0 %v277_v7  ;;  %315 = vmatpush3.bf16.msra.mxu1 %v277_v7  ;;  %v281_v13 = vpack.c.bf16 %v60_v10, %v59_v9  ;;  %v283_v14 = vpack.c.bf16 %v78_v12, %v77_v11  ;;  %v62_v16 = vld [vmem:[#allocation5 + $0x28] sm:$0xff]  ;;  %v79_v17 = vld [vmem:[#allocation5 + $0xb0] sm:$0xff]  ;;  %v80_v18 = vld [vmem:[#allocation5 + $0xb8] sm:$0xff] }
  0x2c   :  { %280 = vmatprep.subr.bf16.mxu0 %v279_v8  ;;  %308 = vmatprep.subr.bf16.mxu1 %v279_v8  ;;  %v285_v19 = vpack.c.bf16 %v62_v16, %v61_v15  ;;  %v287_v20 = vpack.c.bf16 %v80_v18, %v79_v17  ;;  %v63_v21 = vld [vmem:[#allocation5 + $0x30] sm:$0xff]  ;;  %v64_v22 = vld [vmem:[#allocation5 + $0x38] sm:$0xff]  ;;  %v81_v23 = vld [vmem:[#allocation5 + $0xc0] sm:$0xff] }
  0x2d   :  { %v82_v24 = vld [vmem:[#allocation5 + $0xc8] sm:$0xff]  ;;  %v44_v25 = vld [vmem:[#allocation2 + $0x8] sm:$0xff]  ;;  %v289_v27 = vpack.c.bf16 %v64_v22, %v63_v21  ;;  %v65_v29 = vld [vmem:[#allocation5 + $0x40] sm:$0xff] }
  0x2e   :  { %160 = vmatprep.mubr.f32.mxu0 %v44_v25  ;;  %v52_v26 = vld [vmem:[#allocation2 + $0x48] sm:$0xff]  ;;  %v291_v28 = vpack.c.bf16 %v82_v24, %v81_v23  ;;  %v66_v30 = vld [vmem:[#allocation5 + $0x48] sm:$0xff]  ;;  %v83_v31 = vld [vmem:[#allocation5 + $0xd0] sm:$0xff] }
  0x2f   :  { %282 = vmatpush3.bf16.msra.mxu0 %v281_v13  ;;  %316 = vmatpush3.bf16.msra.mxu1 %v281_v13  ;;  %v84_v32 = vld [vmem:[#allocation5 + $0xd8] sm:$0xff]  ;;  %v293_v33 = vpack.c.bf16 %v66_v30, %v65_v29  ;;  %v67_v35 = vld [vmem:[#allocation5 + $0x50] sm:$0xff]  ;;  %v85_v37 = vld [vmem:[#allocation5 + $0xe0] sm:$0xff] }
  0x30   :  { %284 = vmatprep.subr.bf16.mxu0 %v283_v14  ;;  %309 = vmatprep.subr.bf16.mxu1 %v283_v14  ;;  %v295_v34 = vpack.c.bf16 %v84_v32, %v83_v31  ;;  %v68_v36 = vld [vmem:[#allocation5 + $0x58] sm:$0xff]  ;;  %v86_v38 = vld [vmem:[#allocation5 + $0xe8] sm:$0xff]  ;;  %v69_v41 = vld [vmem:[#allocation5 + $0x60] sm:$0xff] }
  0x31   :  { %180 = vmatprep.mubr.f32.mxu1 %v52_v26  ;;  %v297_v39 = vpack.c.bf16 %v68_v36, %v67_v35  ;;  %v299_v40 = vpack.c.bf16 %v86_v38, %v85_v37  ;;  %v70_v42 = vld [vmem:[#allocation5 + $0x68] sm:$0xff]  ;;  %v87_v43 = vld [vmem:[#allocation5 + $0xf0] sm:$0xff]  ;;  %v88_v44 = vld [vmem:[#allocation5 + $0xf8] sm:$0xff] }
  0x32   :  { %v301_v45 = vpack.c.bf16 %v70_v42, %v69_v41  ;;  %v303_v46 = vpack.c.bf16 %v88_v44, %v87_v43  ;;  %v71_v47 = vld [vmem:[#allocation5 + $0x70] sm:$0xff]  ;;  %v72_v48 = vld [vmem:[#allocation5 + $0x78] sm:$0xff]  ;;  %v46_v52 = vld [vmem:[#allocation2 + $0x18] sm:$0xff] }
  0x33   :  { %286 = vmatpush3.bf16.msra.mxu0 %v285_v19  ;;  %317 = vmatpush3.bf16.msra.mxu1 %v285_v19  ;;  %v305_v49 = vpack.c.bf16 %v72_v48, %v71_v47  ;;  %v43_v50 = vld [vmem:[#allocation2] sm:$0xff]  ;;  %v54_v53 = vld [vmem:[#allocation2 + $0x58] sm:$0xff]  ;;  %v45_v54 = vld [vmem:[#allocation2 + $0x10] sm:$0xff] }
  0x34   :  { %288 = vmatprep.subr.bf16.mxu0 %v287_v20  ;;  %310 = vmatprep.subr.bf16.mxu1 %v287_v20  ;;  %v51_v51 = vld [vmem:[#allocation2 + $0x40] sm:$0xff]  ;;  %v53_v55 = vld [vmem:[#allocation2 + $0x50] sm:$0xff]  ;;  %v48_v56 = vld [vmem:[#allocation2 + $0x28] sm:$0xff] }
  0x35   :  { %v56_v57 = vld [vmem:[#allocation2 + $0x68] sm:$0x3]  ;;  %v47_v58 = vld [vmem:[#allocation2 + $0x20] sm:$0xff]  ;;  %v50_v60 = vld [vmem:[#allocation2 + $0x38] sm:$0xff] }
  0x36   :  { %v55_v59 = vld [vmem:[#allocation2 + $0x60] sm:$0x3]  ;;  %v49_v61 = vld [vmem:[#allocation2 + $0x30] sm:$0xff] }
  0x37   :  { %290 = vmatpush3.bf16.msra.mxu0 %v289_v27  ;;  %318 = vmatpush3.bf16.msra.mxu1 %v289_v27  ;;  %v221_v0 = vld [vmem:[%s476_s2] ss:$0 sm:$0xff]  ;;  %s408_s2 = smov [#allocation7]  }
  0x38   :  { %292 = vmatprep.subr.bf16.mxu0 %v291_v28  ;;  %311 = vmatprep.subr.bf16.mxu1 %v291_v28  ;;  %s208_s13 = sshll.u32 %s408_s2, 4  ;;  %s209_s13 = int_to_ptr.vmem [resolvable:$true] %s208_s13 }
  0x39   :  { %s374_s14 = scalar_lea.vmem %s209_s13, 896  ;;  %p379_p3 = scmp.lt.s32.totalorder %s209_s13, %s209_s13 }
  0x3a   :  { %p375_p2 = scmp.ne.s32.totalorder %s209_s13, %s374_s14  ;;  %p380_p4 = scmp.lt.s32.totalorder %s374_s14, %s374_s14 }
  0x3b   :  { %294 = vmatpush3.bf16.msra.mxu0 %v293_v33  ;;  %319 = vmatpush3.bf16.msra.mxu1 %v293_v33 }
  0x3c   :  { %296 = vmatprep.subr.bf16.mxu0 %v295_v34  ;;  %312 = vmatprep.subr.bf16.mxu1 %v295_v34  ;;  %p381_p5 = por %p380_p4, %p379_p3 }
  0x3e   :  { %p382_p6 = pnand %p381_p5, %p375_p2 }
  0x3f   :  { %298 = vmatpush3.bf16.msra.mxu0 %v297_v39  ;;  %320 = vmatpush3.bf16.msra.mxu1 %v297_v39 }
  0x40   :  { %300 = vmatprep.subr.bf16.mxu0 %v299_v40  ;;  %313 = vmatprep.subr.bf16.mxu1 %v299_v40 }
  0x43   :  { %302 = vmatpush3.bf16.msra.mxu0 %v301_v45  ;;  %321 = vmatpush3.bf16.msra.mxu1 %v301_v45 }
  0x44   :  { %304 = vmatprep.subr.bf16.mxu0 %v303_v46  ;;  %314 = vmatprep.subr.bf16.mxu1 %v303_v46 }
  0x47   :  { %306 = vmatpush3.bf16.msra.mxu0 %v305_v49  ;;  %322 = vmatpush3.bf16.msra.mxu1 %v305_v49 }
  0x4a   :  { %161 = vmatmul.mubr.f32.vlgmr.msra.gmra.mrb[0].mxu0 %v43_v50  ;;  %181 = vmatmul.mubr.f32.vlgmr.msra.gmra.mrb[0].mxu1 %v51_v51 }
  0x4b   :  { %165 = vmatprep.mubr.f32.mxu0 %v46_v52  ;;  %185 = vmatprep.mubr.f32.mxu1 %v54_v53 }
  0x4e   :  { %166 = vmatmul.mubr.f32.gmra.mrb[2].mxu0 %v45_v54  ;;  %186 = vmatmul.mubr.f32.gmra.mrb[2].mxu1 %v53_v55 }
  0x4f   :  { %170 = vmatprep.mubr.f32.mxu0 %v48_v56  ;;  %190 = vmatprep.mubr.f32.mxu1 %v56_v57 }
  0x52   :  { %171 = vmatmul.mubr.f32.gmra.mrb[4].mxu0 %v47_v58  ;;  %191 = vmatmul.mubr.f32.gmra.mrb[4].mxu1 %v55_v59 }
  0x53   :  { %175 = vmatprep.mubr.f32.mxu0 %v50_v60 }
  0x56   :  { %176 = vmatmul.mubr.f32.gmra.mrb[6].mxu0 %v49_v61 }
 0x11d   :  { %v254_v62 = vpop.f32.mrb[0].mxu0  ;;  %v266_v63 = vpop.f32.mrb[0].mxu1 }
 0x11e   :  { %v255_v1 = vpop.f32.mrb[1].mxu0  ;;  %v267_v2 = vpop.f32.mrb[1].mxu1 }
 0x11f   :  { %v256_v3 = vadd.f32 %v255_v1, %v254_v62  ;;  %v268_v4 = vadd.f32 %v267_v2, %v266_v63 }
 0x121   :  { %v163_v5 = vadd.f32 %v256_v3, %v221_v0  ;;  %v257_v6 = vpop.f32.mrb[2].mxu0  ;;  %v183_v7 = vadd.f32 %v268_v4, %v221_v0  ;;  %v269_v8 = vpop.f32.mrb[2].mxu1 }
 0x122   :  { %v258_v9 = vpop.f32.mrb[3].mxu0  ;;  %v270_v10 = vpop.f32.mrb[3].mxu1 }
 0x123   :  { %196 = vst [vmem:[#allocation7] sm:$0xff] %v163_v5  ;;  %200 = vst [vmem:[#allocation7 + $0x20] sm:$0xff] %v183_v7  ;;  %v259_v11 = vadd.f32 %v258_v9, %v257_v6  ;;  %v271_v12 = vadd.f32 %v270_v10, %v269_v8 }
 0x125   :  { %v168_v13 = vadd.f32 %v259_v11, %v221_v0  ;;  %v260_v14 = vpop.f32.mrb[4].mxu0  ;;  %v188_v15 = vadd.f32 %v271_v12, %v221_v0  ;;  %v272_v16 = vpop.f32.mrb[4].mxu1 }
 0x126   :  { %v261_v17 = vpop.f32.mrb[5].mxu0  ;;  %v273_v18 = vpop.f32.mrb[5].mxu1 }
 0x127   :  { %197 = vst [vmem:[#allocation7 + $0x8] sm:$0xff] %v168_v13  ;;  %201 = vst [vmem:[#allocation7 + $0x28] sm:$0xff] %v188_v15  ;;  %v262_v19 = vadd.f32 %v261_v17, %v260_v14  ;;  %v274_v20 = vadd.f32 %v273_v18, %v272_v16 }
 0x129   :  { %v173_v21 = vadd.f32 %v262_v19, %v221_v0  ;;  %v263_v22 = vpop.f32.mrb[6].mxu0  ;;  %v193_v23 = vadd.f32 %v274_v20, %v221_v0 }
 0x12a   :  { %v264_v24 = vpop.f32.mrb[7].mxu0 }
 0x12b   :  { %198 = vst [vmem:[#allocation7 + $0x10] sm:$0xff] %v173_v21  ;;  %202 = vst [vmem:[#allocation7 + $0x30] sm:$0x3] %v193_v23  ;;  %v265_v25 = vadd.f32 %v264_v24, %v263_v22 }
 0x12d   :  { %v178_v26 = vadd.f32 %v265_v25, %v221_v0 }
 0x12f   :  { %199 = vst [vmem:[#allocation7 + $0x18] sm:$0xff] %v178_v26 }
 0x130   :  { %385 = shalt.err (!%p382_p6)
}
 0x131   :  { %s386_s17 = scalar_lea.hbm %s477_s3, 896 }
 0x132   :  { %p387_p7 = scmp.ne.s32.totalorder %s477_s3, %s386_s17  ;;  %p390_p8 = scmp.lt.u32.totalorder %s386_s17, %s477_s3 }
 0x134   :  { %p392_p9 = pnand %p390_p8, %p387_p7 }
 0x136   :  { %395 = shalt.err (!%p392_p9)
}
 0x137   :  { %214 = dma.vmem_to_hbm [thread:$0]  %s209_s13, 896, %s477_s3, [#allocation4], %s406_s0, %s406_s0, %s407_s9  }
 0x138   :  { %400 = dma.done.wait [#allocation4], 896  }
 0x139   :  { %401 = vsyncadd [#allocation4], 4294966400 }
 0x13a   :  { %218 = vsyncpa [#allocation3], 1 }
 0x13b   :  { %219 = vsyncpa [#allocation6], 1 }
 0x13c   :  { %220 = vsyncpa [#allocation4], 1 }

</bundles_post_ra>
